<compile_context>
chip_gen: v7x
topology: tpu7x:2x2x1
jax: 0.10.0
libtpu: 0.0.40
codegen_flags: <defaults>
</compile_context>

<pallas_src>
import jax
import jax.numpy as jnp
from jax.experimental import pallas as pl
from jax.experimental.pallas import tpu as pltpu


def _symrelu_kernel(b_ref, x_ref, o_ref):
    # b_ref: (1,) float32 scalar in SMEM; x_ref/o_ref: (tm, lanes) VMEM tiles.
    x = x_ref[...]
    b = b_ref[0].astype(x.dtype)           # compute in the input dtype
    # relu(x-b) - relu(-x-b) == max(x-b, 0) + min(x+b, 0)
    out = jnp.maximum(x - b, 0.0) + jnp.minimum(x + b, 0.0)
    o_ref[...] = out.astype(o_ref.dtype)


def symmetric_relu(x, b, *, block_bytes=2 * 1024 * 1024):
    """Elementwise SymmetricReLU. x: any-shape float array, b: scalar."""
    orig_shape = x.shape
    dtype = x.dtype
    n = x.size

    # --- choose a lane-dense 2D layout (no data movement, just reshape) ----
    lanes = None
    for cand in (1024, 512, 256, 128):
        if n % cand == 0:
            lanes = cand
            break

    x_flat = jnp.ravel(x)
    padded = False
    if lanes is None:
        # Ragged size: pad the flat array up to a multiple of 128 lanes.
        # (Padded zeros give max(-b,0)+min(b,0) which is sliced off anyway.)
        lanes = 128
        n_pad = ((n + lanes - 1) // lanes) * lanes
        x_flat = jnp.pad(x_flat, (0, n_pad - n))
        padded = True
        rows = n_pad // lanes
    else:
        rows = n // lanes

    x2d = x_flat.reshape(rows, lanes)

    # --- block sizing: ~block_bytes per block, rows multiple of 8 ----------
    itemsize = jnp.dtype(dtype).itemsize
    target_rows = max(8, block_bytes // (lanes * itemsize))
    if rows <= target_rows:
        tm = rows                      # single block spanning full row extent
    else:
        tm = (target_rows // 8) * 8    # (8,128)-aligned tile rows

    grid = (pl.cdiv(rows, tm),)        # partial last block is masked by Pallas

    b_arr = jnp.asarray(b, dtype=jnp.float32).reshape((1,))

    out2d = pl.pallas_call(
        _symrelu_kernel,
        out_shape=jax.ShapeDtypeStruct((rows, lanes), dtype),
        grid_spec=pltpu.PrefetchScalarGridSpec(
            num_scalar_prefetch=0,
            grid=grid,
            in_specs=[
                pl.BlockSpec(memory_space=pltpu.SMEM),           # scalar b
                pl.BlockSpec((tm, lanes), lambda i: (i, 0)),     # x tile
            ],
            out_specs=pl.BlockSpec((tm, lanes), lambda i: (i, 0)),
        ),
        compiler_params=pltpu.CompilerParams(
            dimension_semantics=("parallel",)),
    )(b_arr, x2d)

    out_flat = out2d.reshape(-1)
    if padded:
        out_flat = out_flat[:n]
    return out_flat.reshape(orig_shape)


def symmetric_relu_ref(x, b):
    # Pure-JAX reference of the PyTorch forward.
    return jnp.maximum(x - b, 0.0) - jnp.maximum(-x - b, 0.0)


if __name__ == "__main__":
    key = jax.random.PRNGKey(0)
    b = jnp.float32(0.25)  # nonzero so both branches are exercised

    # 1) Small NCHW feature map (the spec's typical input). 2048 elems,
    #    128-divisible -> no pad, single (2, 1024) block.
    x1 = jax.random.normal(key, (2, 4, 16, 16), dtype=jnp.float32)
    out1 = jax.block_until_ready(symmetric_relu(x1, b))
    ref1 = symmetric_relu_ref(x1, b)
    assert out1.shape == x1.shape and out1.dtype == x1.dtype
    assert jnp.allclose(out1, ref1, atol=1e-6, rtol=1e-6)

    # 2) Larger map exercising the multi-block path (grid > 1, ~2 MiB tiles).
    k2, _ = jax.random.split(key)
    x2 = jax.random.normal(k2, (4, 128, 64, 64), dtype=jnp.float32)
    out2 = jax.block_until_ready(symmetric_relu(x2, b))
    assert jnp.allclose(out2, symmetric_relu_ref(x2, b), atol=1e-6, rtol=1e-6)

    # 3) Ragged size exercising the pad+slice fallback path.
    k3, _ = jax.random.split(k2)
    x3 = jax.random.normal(k3, (3, 5, 7), dtype=jnp.float32)
    out3 = jax.block_until_ready(symmetric_relu(x3, b))
    assert jnp.allclose(out3, symmetric_relu_ref(x3, b), atol=1e-6, rtol=1e-6)

    # 4) bf16 input: compute stays in bf16 inside the kernel.
    x4 = jax.random.normal(key, (2, 4, 16, 16), dtype=jnp.bfloat16)
    out4 = jax.block_until_ready(symmetric_relu(x4, b))
    ref4 = symmetric_relu_ref(x4.astype(jnp.float32), b).astype(jnp.bfloat16)
    assert out4.dtype == jnp.bfloat16
    assert jnp.allclose(out4.astype(jnp.float32), ref4.astype(jnp.float32),
                        atol=1e-2, rtol=1e-2)

    print("KERNEL_OK")
</pallas_src>

<mosaic_0001>
module attributes {stable_mosaic.version = 11 : i64} {
  func.func @_symrelu_kernel(%arg0: i32, %arg1: memref<1xf32, #tpu.memory_space<smem>>, %arg2: memref<2x1024xf32, #tpu.memory_space<vmem>>, %arg3: memref<2x1024xf32, #tpu.memory_space<vmem>>) attributes {dimension_semantics = [#tpu.dimension_semantics<parallel>], iteration_bounds = array<i64: 1>, scalar_prefetch = 0 : i64, scratch_operands = 0 : i64, tpu.core_type = #tpu.core_type<tc>, window_params = [{transform_indices = @transform_0, window_bounds = array<i64: 1>}, {transform_indices = @transform_1, window_bounds = array<i64: 2, 1024>}, {transform_indices = @transform_2, window_bounds = array<i64: 2, 1024>}]} {
    %c0 = arith.constant 0 : index
    %c0_0 = arith.constant 0 : index
    %0 = vector.load %arg2[%c0, %c0_0] : memref<2x1024xf32, #tpu.memory_space<vmem>>, vector<2x1024xf32>
    %c0_1 = arith.constant 0 : index
    %1 = memref.load %arg1[%c0_1] : memref<1xf32, #tpu.memory_space<smem>>
    %2 = vector.broadcast %1 : f32 to vector<2x1024xf32>
    %3 = arith.subf %0, %2 : vector<2x1024xf32>
    %cst = arith.constant 0.000000e+00 : f32
    %4 = vector.broadcast %cst : f32 to vector<2x1024xf32>
    %5 = arith.maximumf %3, %4 : vector<2x1024xf32>
    %6 = vector.broadcast %1 : f32 to vector<2x1024xf32>
    %7 = arith.addf %0, %6 : vector<2x1024xf32>
    %cst_2 = arith.constant 0.000000e+00 : f32
    %8 = vector.broadcast %cst_2 : f32 to vector<2x1024xf32>
    %9 = arith.minimumf %7, %8 : vector<2x1024xf32>
    %10 = arith.addf %5, %9 : vector<2x1024xf32>
    %c0_3 = arith.constant 0 : index
    %c0_4 = arith.constant 0 : index
    %11 = vector.load %arg3[%c0_3, %c0_4] : memref<2x1024xf32, #tpu.memory_space<vmem>>, vector<2x1024xf32>
    tpu.vector_store %arg3[%c0_3, %c0_4], %10 {strides = array<i32>} : memref<2x1024xf32, #tpu.memory_space<vmem>>, vector<2x1024xf32>,
    return
  }
  func.func @transform_0(%arg0: i32) -> i32 {
    %c0_i32 = arith.constant 0 : i32
    %c0_i32_0 = arith.constant 0 : i32
    return %c0_i32 : i32
  }
  func.func @transform_1(%arg0: i32) -> (i32, i32) {
    %c0_i32 = arith.constant 0 : i32
    %c0_i32_0 = arith.constant 0 : i32
    return %arg0, %c0_i32 : i32, i32
  }
  func.func @transform_2(%arg0: i32) -> (i32, i32) {
    %c0_i32 = arith.constant 0 : i32
    %c0_i32_0 = arith.constant 0 : i32
    return %arg0, %c0_i32 : i32, i32
  }
}

</mosaic_0001>

<bundles_post_ra>
// kernel: tpu_custom_call.1
= control target key start
LH: loop header
LB: loop body
LE: loop exit
PB: predicated region body
PF: predicated region fallthrough
CT: control target
= control target key end

     0   :  { %8 = vsyncpa [#allocation4], 0  ;;  %s150_s0 = inlined_call_operand.<no memory space> [shape: f32[1], index: 0, kind: input, shape index: {}]   ;;  %s151_s1 = inlined_call_operand.hbm [shape: f32[2,1024], index: 1, kind: input, shape index: {}]   ;;  %s152_s2 = inlined_call_operand.hbm [shape: f32[2,1024], index: 2, kind: output, shape index: {}]  }
   0x1   :  { %9 = vsyncpa [#allocation5], 0  ;;  %s106_s9 = smov [#allocation3]   ;;  %s58_s13 = scalar_lea.hbm %s151_s1, 256 }
   0x2   :  { %s18_s10 = sshll.u32 %s106_s9, 4  ;;  %p59_p0 = scmp.ne.s32.totalorder %s151_s1, %s58_s13  ;;  %s19_s10 = int_to_ptr.vmem [resolvable:$true] %s18_s10 }
   0x3   :  { %p62_p1 = scmp.lt.u32.totalorder %s58_s13, %s151_s1 }
   0x5   :  { %p64_p2 = pnand %p62_p1, %p59_p0 }
   0x7   :  { %67 = shalt.err (!%p64_p2)
}
   0x8   :  { %s68_s18 = scalar_lea.vmem %s19_s10, 256  ;;  %p73_p4 = scmp.lt.s32.totalorder %s19_s10, %s19_s10 }
   0x9   :  { %p69_p3 = scmp.ne.s32.totalorder %s19_s10, %s68_s18  ;;  %p74_p5 = scmp.lt.s32.totalorder %s68_s18, %s68_s18 }
   0xb   :  { %p75_p6 = por %p74_p5, %p73_p4 }
   0xd   :  { %p76_p7 = pnand %p75_p6, %p69_p3 }
   0xf   :  { %79 = shalt.err (!%p76_p7)
}
  0x10   :  { %21 = dma.hbm_to_vmem [thread:$0]  %s151_s1, 256, %s19_s10, [#allocation4]  }
  0x11   :  { %102 = dma.done.wait [#allocation4], 256  }
  0x12   :  { %103 = vsyncadd [#allocation4], 4294967040  ;;  %v28_v0 = vstv %s150_s0  ;;  %v25_v1 = vld [vmem:[#allocation3] sm:$0xff]  ;;  %v26_v2 = vld [vmem:[#allocation3 + $0x8] sm:$0xff]  ;;  %s107_s23 = smov [#allocation6]  }
  0x13   :  { %v29_v3 = vsub.f32 %v25_v1, %v28_v0  ;;  %v33_v4 = vadd.f32 %v28_v0, %v25_v1  ;;  %v30_v5 = vsub.f32 %v26_v2, %v28_v0  ;;  %v34_v6 = vadd.f32 %v28_v0, %v26_v2  ;;  %s47_s24 = sshll.u32 %s107_s23, 4  ;;  %s48_s24 = int_to_ptr.vmem [resolvable:$true] %s47_s24 }
  0x14   :  { %s80_s1 = scalar_lea.vmem %s48_s24, 256  ;;  %p85_p9 = scmp.lt.s32.totalorder %s48_s24, %s48_s24 }
  0x15   :  { %v31_v7 = vmax.f32 %v29_v3, 0.0  ;;  %v35_v8 = vmin.f32 %v33_v4, 0.0  ;;  %v32_v9 = vmax.f32 %v30_v5, 0.0  ;;  %v36_v10 = vmin.f32 %v34_v6, 0.0  ;;  %p81_p8 = scmp.ne.s32.totalorder %s48_s24, %s80_s1  ;;  %p86_p10 = scmp.lt.s32.totalorder %s80_s1, %s80_s1 }
  0x17   :  { %v37_v11 = vadd.f32 %v35_v8, %v31_v7  ;;  %v38_v12 = vadd.f32 %v36_v10, %v32_v9  ;;  %p87_p11 = por %p86_p10, %p85_p9 }
  0x19   :  { %39 = vst [vmem:[#allocation6] sm:$0xff] %v37_v11  ;;  %40 = vst [vmem:[#allocation6 + $0x8] sm:$0xff] %v38_v12  ;;  %p88_p12 = pnand %p87_p11, %p81_p8 }
  0x1b   :  { %91 = shalt.err (!%p88_p12)
}
  0x1c   :  { %s92_s26 = scalar_lea.hbm %s152_s2, 256 }
  0x1d   :  { %p93_p13 = scmp.ne.s32.totalorder %s152_s2, %s92_s26  ;;  %p96_p0 = scmp.lt.u32.totalorder %s92_s26, %s152_s2 }
  0x1f   :  { %p98_p1 = pnand %p96_p0, %p93_p13 }
  0x21   :  { %101 = shalt.err (!%p98_p1)
}
  0x22   :  { %50 = dma.vmem_to_hbm [thread:$0]  %s48_s24, 256, %s152_s2, [#allocation5]  }
  0x23   :  { %104 = dma.done.wait [#allocation5], 256  }
  0x24   :  { %105 = vsyncadd [#allocation5], 4294967040 }
  0x25   :  { %54 = vsyncpa [#allocation4], 1 }
  0x26   :  { %55 = vsyncpa [#allocation5], 1 }

</bundles_post_ra>
